<compile_context>
chip_gen: v5e
topology: v5e:2x2
jax: 0.10.0
libtpu: 0.0.40
codegen_flags: <defaults>
</compile_context>

<pallas_src>
import functools

import jax
import jax.numpy as jnp
from jax.experimental import pallas as pl
from jax.experimental.pallas import tpu as pltpu


def _round_up(x, m):
    return (x + m - 1) // m * m


def _exloss_kernel(x_ref, v_ref, tgt_ref, logits_ref, loss_ref,
                   m_sc, l_sc, t_sc, *, t, num_classes, mask_classes):
    ci = pl.program_id(1)

    @pl.when(ci == 0)
    def _():
        m_sc[...] = jnp.full_like(m_sc, -jnp.inf)
        l_sc[...] = jnp.zeros_like(l_sc)
        t_sc[...] = jnp.zeros_like(t_sc)

    # MXU matmul contracting the feature dim of BOTH operands (no in-kernel transpose).
    # Operands stay in their (bf16) storage dtype; accumulate in f32.
    # [TILE_B, F] x [TILE_C, F] -> [TILE_B, TILE_C]
    logits = jax.lax.dot_general(
        x_ref[...], v_ref[...],
        dimension_numbers=(((1,), (1,)), ((), ())),
        preferred_element_type=jnp.float32) * t
    logits_ref[...] = logits.astype(logits_ref.dtype)

    tile_b, tile_c = logits.shape
    # Class ids covered by this C tile (needed for the gather-free target pick anyway).
    col = jax.lax.broadcasted_iota(jnp.int32, (tile_b, tile_c), 1) + ci * tile_c

    # Gather-free target logit: iota-vs-target compare, masked sum (at most one hit per row).
    hit = col == tgt_ref[...]
    t_sc[...] += jnp.sum(jnp.where(hit, logits, 0.0), axis=1, keepdims=True)

    def _accumulate(vals):
        # Online softmax accumulation across C tiles (all math in f32).
        m_cur = jnp.max(vals, axis=1, keepdims=True)
        m_new = jnp.maximum(m_sc[...], m_cur)
        alpha = jnp.exp(m_sc[...] - m_new)            # exp(-inf) == 0 handles init
        l_sc[...] = alpha * l_sc[...] + jnp.sum(jnp.exp(vals - m_new),
                                                axis=1, keepdims=True)
        m_sc[...] = m_new

    if mask_classes:
        # Only when C % tile_c != 0 (static): padded classes live exclusively in the last
        # C tile, so the -inf mask is gated to that tile; other tiles take the raw path.
        last = pl.num_programs(1) - 1

        @pl.when(ci != last)
        def _():
            _accumulate(logits)

        @pl.when(ci == last)
        def _():
            _accumulate(jnp.where(col < num_classes, logits, -jnp.inf))
    else:
        _accumulate(logits)

    @pl.when(ci == pl.num_programs(1) - 1)
    def _():
        # Per-row cross-entropy: logsumexp - target_logit.
        loss_ref[...] = m_sc[...] + jnp.log(l_sc[...]) - t_sc[...]


def ex_loss_forward(inputs, targets, V, t=1.0, *, tile_b=256, tile_c=512,
                    compute_dtype=jnp.bfloat16, logits_dtype=jnp.float32):
    """ExLoss.forward: returns (loss, outputs).

    inputs:  [B, F] float
    targets: [B]    int class ids in [0, C)
    V:       [C, F] float (the module's 'V' buffer)
    """
    B, F = inputs.shape
    C, Fv = V.shape
    assert F == Fv

    compute_dtype = jnp.dtype(compute_dtype)
    logits_dtype = jnp.dtype(logits_dtype)

    x = inputs.astype(compute_dtype)      # no-op if already stored in compute_dtype
    v = V.astype(compute_dtype)
    targets = targets.astype(jnp.int32)

    in_bytes = compute_dtype.itemsize
    out_bytes = logits_dtype.itemsize
    b_align = 16 if in_bytes == 2 else 8  # bf16 packs 16 rows per sublane tile

    def footprint(tb, tc):
        per_step = (tb * F * in_bytes          # x tile
                    + tc * F * in_bytes        # V tile
                    + tb * 4                   # targets column
                    + tb * tc * out_bytes      # logits tile
                    + tb * 4)                  # per-row loss
        return 2 * per_step + 3 * tb * 4       # double-buffering + f32 scratch

    # --- class (C) tiling: lane-dense multiples of 128 ---
    tile_c = max(128, min(tile_c, _round_up(C, 128)))
    tile_c = tile_c // 128 * 128

    # --- batch (B) tiling ---
    tile_b = max(b_align, min(tile_b, _round_up(B, b_align)))
    tile_b = tile_b // b_align * b_align
    # Keep both v7x TensorCores busy: >= 2 tiles along the "parallel" batch axis when B allows.
    if _round_up(B, tile_b) // tile_b < 2 and _round_up(B, b_align) >= 2 * b_align:
        tile_b = _round_up((B + 1) // 2, b_align)

    # --- shrink tiles until the double-buffered footprint fits a v7x-safe VMEM budget ---
    VMEM_BUDGET = 48 << 20
    while tile_c > 128 and footprint(tile_b, tile_c) > VMEM_BUDGET:
        tile_c = max(128, (tile_c // 2) // 128 * 128)
    while tile_b > b_align and footprint(tile_b, tile_c) > VMEM_BUDGET:
        tile_b = max(b_align, (tile_b // 2) // b_align * b_align)

    b_pad = _round_up(B, tile_b)
    c_pad = _round_up(C, tile_c)

    # Pad only when the shapes do not already divide the tiles (persistent V can be kept
    # pre-padded by the caller to avoid even this copy on real workloads).
    if b_pad != B:
        x = jnp.pad(x, ((0, b_pad - B), (0, 0)))
        targets = jnp.pad(targets, (0, b_pad - B))
    if c_pad != C:
        v = jnp.pad(v, ((0, c_pad - C), (0, 0)))
    tgt_col = targets.reshape(b_pad, 1)

    mask_classes = c_pad != C

    vmem_limit = min(max(footprint(tile_b, tile_c) * 3 // 2, 32 << 20), 64 << 20)

    kernel = functools.partial(_exloss_kernel, t=float(t),
                               num_classes=C, mask_classes=mask_classes)

    grid = (b_pad // tile_b, c_pad // tile_c)

    logits_p, loss_rows = pl.pallas_call(
        kernel,
        out_shape=(
            jax.ShapeDtypeStruct((b_pad, c_pad), logits_dtype),
            jax.ShapeDtypeStruct((b_pad, 1), jnp.float32),
        ),
        grid_spec=pltpu.PrefetchScalarGridSpec(
            num_scalar_prefetch=0,
            grid=grid,
            in_specs=[
                pl.BlockSpec((tile_b, F), lambda bi, ci: (bi, 0)),      # x tile (revisited over C)
                pl.BlockSpec((tile_c, F), lambda bi, ci: (ci, 0)),      # V tile (streamed over C)
                pl.BlockSpec((tile_b, 1), lambda bi, ci: (bi, 0)),      # targets column
            ],
            out_specs=(
                pl.BlockSpec((tile_b, tile_c), lambda bi, ci: (bi, ci)),  # logits (lane-dense)
                pl.BlockSpec((tile_b, 1), lambda bi, ci: (bi, 0)),        # per-row loss
            ),
            scratch_shapes=[
                pltpu.VMEM((tile_b, 1), jnp.float32),   # running max  m
                pltpu.VMEM((tile_b, 1), jnp.float32),   # running sum  l
                pltpu.VMEM((tile_b, 1), jnp.float32),   # running target logit
            ],
        ),
        compiler_params=pltpu.CompilerParams(
            # On v7x, pltpu.CORE_PARALLEL on the batch axis is a further option.
            dimension_semantics=("parallel", "arbitrary"),
            vmem_limit_bytes=int(vmem_limit)),
    )(x, v, tgt_col)

    logits = logits_p if (b_pad == B and c_pad == C) else logits_p[:B, :C]
    loss = jnp.sum(loss_rows[:B, 0]) / B        # mean over the TRUE batch size
    return loss, logits


def ex_loss_reference(inputs, targets, V, t=1.0):
    """Plain-JAX reference for verification (f32 math on the same operand values)."""
    logits = jnp.dot(inputs.astype(jnp.float32), V.astype(jnp.float32).T,
                     precision=jax.lax.Precision.HIGHEST) * t
    logp = jax.nn.log_softmax(logits, axis=1)
    loss = -jnp.mean(jnp.take_along_axis(logp, targets[:, None], axis=1))
    return loss, logits


if __name__ == "__main__":
    def run_case(B, F, C, t, tile_b, tile_c, key):
        k_in, k_v, k_tgt = jax.random.split(key, 3)
        inputs = jax.random.normal(k_in, (B, F), dtype=jnp.float32)
        # The module registers V as a zeros buffer; use L2-normalized rows (as the backward
        # pass would maintain) so the matmul/softmax path is actually exercised.
        V = jax.random.normal(k_v, (C, F), dtype=jnp.float32)
        V = V / jnp.linalg.norm(V, axis=1, keepdims=True)
        targets = jax.random.randint(k_tgt, (B,), 0, C, dtype=jnp.int32)

        # bf16 MXU operands: quantize once here so the f32 reference sees the exact same
        # operand values (kernel accumulates in f32, so the comparison stays tight).
        x_bf = inputs.astype(jnp.bfloat16)
        v_bf = V.astype(jnp.bfloat16)

        loss, outputs = ex_loss_forward(x_bf, targets, v_bf, t=t,
                                        tile_b=tile_b, tile_c=tile_c)
        loss = jax.block_until_ready(loss)
        outputs = jax.block_until_ready(outputs)

        loss_ref, outputs_ref = ex_loss_reference(x_bf, targets, v_bf, t=t)
        assert outputs.shape == (B, C)
        assert jnp.allclose(outputs, outputs_ref, atol=2e-3, rtol=2e-3)
        assert jnp.allclose(loss, loss_ref, atol=2e-3, rtol=2e-3)

    key = jax.random.PRNGKey(0)
    k1, k2 = jax.random.split(key)

    # Case 1: B / C do NOT divide the tiles -> exercises padding, the last-tile class mask,
    # and the multi-tile online softmax (grid = (1, 2)).
    run_case(B=10, F=32, C=200, t=2.0, tile_b=128, tile_c=128, key=k1)

    # Case 2: shapes divide the tiles exactly -> no padding, no class mask, and 2 batch tiles
    # (grid = (2, 2)) exercising the multi-core-friendly batch split.
    run_case(B=32, F=64, C=256, t=1.0, tile_b=256, tile_c=128, key=k2)

    # TODO(synk): Exclusive.backward's in-place V[y] = normalize((V[y]+x)/2) update is a
    # training-time side effect and is not part of the forward pass implemented here.
    print("KERNEL_OK")
</pallas_src>

<mosaic_0001>
module attributes {stable_mosaic.version = 11 : i64} {
  func.func @_exloss_kernel(%arg0: i32, %arg1: i32, %arg2: memref<16x32xbf16, #tpu.memory_space<vmem>>, %arg3: memref<128x32xbf16, #tpu.memory_space<vmem>>, %arg4: memref<16x1xi32, #tpu.memory_space<vmem>>, %arg5: memref<16x128xf32, #tpu.memory_space<vmem>>, %arg6: memref<16x1xf32, #tpu.memory_space<vmem>>, %arg7: memref<16x1xf32, #tpu.memory_space<vmem>>, %arg8: memref<16x1xf32, #tpu.memory_space<vmem>>, %arg9: memref<16x1xf32, #tpu.memory_space<vmem>>) attributes {dimension_semantics = [#tpu.dimension_semantics<parallel>, #tpu.dimension_semantics<arbitrary>], iteration_bounds = array<i64: 1, 2>, scalar_prefetch = 0 : i64, scratch_operands = 3 : i64, tpu.core_type = #tpu.core_type<tc>, window_params = [{transform_indices = @transform_0, window_bounds = array<i64: 16, 32>}, {transform_indices = @transform_1, window_bounds = array<i64: 128, 32>}, {transform_indices = @transform_2, window_bounds = array<i64: 16, 1>}, {transform_indices = @transform_3, window_bounds = array<i64: 16, 128>}, {transform_indices = @transform_4, window_bounds = array<i64: 16, 1>}]} {
    %c0_i32 = arith.constant 0 : i32
    %0 = arith.cmpi eq, %arg1, %c0_i32 : i32
    %1 = arith.extui %0 : i1 to i32
    %c0_i32_0 = arith.constant 0 : i32
    %2 = arith.cmpi ne, %1, %c0_i32_0 : i32
    scf.if %2 {
      %cst_20 = arith.constant 0xFF800000 : f32
      %32 = vector.broadcast %cst_20 : f32 to vector<16x1xf32>
      %c0_21 = arith.constant 0 : index
      %c0_22 = arith.constant 0 : index
      %33 = vector.load %arg7[%c0_21, %c0_22] : memref<16x1xf32, #tpu.memory_space<vmem>>, vector<16x1xf32>
      tpu.vector_store %arg7[%c0_21, %c0_22], %32 {strides = array<i32>} : memref<16x1xf32, #tpu.memory_space<vmem>>, vector<16x1xf32>,
      %cst_23 = arith.constant 0.000000e+00 : f32
      %34 = vector.broadcast %cst_23 : f32 to vector<16x1xf32>
      %c0_24 = arith.constant 0 : index
      %c0_25 = arith.constant 0 : index
      %35 = vector.load %arg8[%c0_24, %c0_25] : memref<16x1xf32, #tpu.memory_space<vmem>>, vector<16x1xf32>
      tpu.vector_store %arg8[%c0_24, %c0_25], %34 {strides = array<i32>} : memref<16x1xf32, #tpu.memory_space<vmem>>, vector<16x1xf32>,
      %cst_26 = arith.constant 0.000000e+00 : f32
      %36 = vector.broadcast %cst_26 : f32 to vector<16x1xf32>
      %c0_27 = arith.constant 0 : index
      %c0_28 = arith.constant 0 : index
      %37 = vector.load %arg9[%c0_27, %c0_28] : memref<16x1xf32, #tpu.memory_space<vmem>>, vector<16x1xf32>
      tpu.vector_store %arg9[%c0_27, %c0_28], %36 {strides = array<i32>} : memref<16x1xf32, #tpu.memory_space<vmem>>, vector<16x1xf32>,
    } else {
    }
    %c0 = arith.constant 0 : index
    %c0_1 = arith.constant 0 : index
    %3 = vector.load %arg2[%c0, %c0_1] : memref<16x32xbf16, #tpu.memory_space<vmem>>, vector<16x32xbf16>
    %c0_2 = arith.constant 0 : index
    %c0_3 = arith.constant 0 : index
    %4 = vector.load %arg3[%c0_2, %c0_3] : memref<128x32xbf16, #tpu.memory_space<vmem>>, vector<128x32xbf16>
    %cst = arith.constant dense<0.000000e+00> : vector<16x128xf32>
    %5 = tpu.matmul %3, %4, %cst {dimension_numbers = #tpu.dot_dimension_numbers<[1], [1], [0], [0], [0, 0, 1, 0], [], []>} : vector<16x32xbf16>, vector<128x32xbf16>, vector<16x128xf32> -> vector<16x128xf32>
    %cst_4 = arith.constant 2.000000e+00 : f32
    %6 = vector.broadcast %cst_4 : f32 to vector<16x128xf32>
    %7 = arith.mulf %5, %6 : vector<16x128xf32>
    %c0_5 = arith.constant 0 : index
    %c0_6 = arith.constant 0 : index
    %8 = vector.load %arg5[%c0_5, %c0_6] : memref<16x128xf32, #tpu.memory_space<vmem>>, vector<16x128xf32>
    tpu.vector_store %arg5[%c0_5, %c0_6], %7 {strides = array<i32>} : memref<16x128xf32, #tpu.memory_space<vmem>>, vector<16x128xf32>,
    %9 = tpu.iota {dimensions = array<i32: 1>} : vector<16x128xi32>
    %c128_i32 = arith.constant 128 : i32
    %10 = arith.muli %arg1, %c128_i32 : i32
    %11 = vector.broadcast %10 : i32 to vector<16x128xi32>
    %12 = arith.addi %9, %11 : vector<16x128xi32>
    %c0_7 = arith.constant 0 : index
    %c0_8 = arith.constant 0 : index
    %13 = vector.load %arg4[%c0_7, %c0_8] : memref<16x1xi32, #tpu.memory_space<vmem>>, vector<16x1xi32>
    %14 = vector.broadcast %13 : vector<16x1xi32> to vector<16x128xi32>
    %15 = arith.cmpi eq, %12, %14 : vector<16x128xi32>
    %c0_9 = arith.constant 0 : index
    %c0_10 = arith.constant 0 : index
    %16 = vector.load %arg9[%c0_9, %c0_10] : memref<16x1xf32, #tpu.memory_space<vmem>>, vector<16x1xf32>
    %cst_11 = arith.constant 0.000000e+00 : f32
    %17 = vector.broadcast %cst_11 : f32 to vector<16x128xf32>
    %18 = arith.select %15, %7, %17 : vector<16x128xi1>, vector<16x128xf32>
    %cst_12 = arith.constant dense<0.000000e+00> : vector<16xf32>
    %19 = vector.multi_reduction <add>, %18, %cst_12 [1] : vector<16x128xf32> to vector<16xf32>
    %20 = vector.shape_cast %19 : vector<16xf32> to vector<16x1xf32>
    %21 = arith.addf %16, %20 : vector<16x1xf32>
    %c0_13 = arith.constant 0 : index
    %c0_14 = arith.constant 0 : index
    %22 = vector.load %arg9[%c0_13, %c0_14] : memref<16x1xf32, #tpu.memory_space<vmem>>, vector<16x1xf32>
    tpu.vector_store %arg9[%c0_13, %c0_14], %21 {strides = array<i32>} : memref<16x1xf32, #tpu.memory_space<vmem>>, vector<16x1xf32>,
    %c1_i32 = arith.constant 1 : i32
    %23 = arith.cmpi ne, %arg1, %c1_i32 : i32
    %24 = arith.extui %23 : i1 to i32
    %c0_i32_15 = arith.constant 0 : i32
    %25 = arith.cmpi ne, %24, %c0_i32_15 : i32
    scf.if %25 {
      %cst_20 = arith.constant dense<0xFF800000> : vector<16xf32>
      %32 = vector.multi_reduction <maximumf>, %7, %cst_20 [1] : vector<16x128xf32> to vector<16xf32>
      %33 = vector.shape_cast %32 : vector<16xf32> to vector<16x1xf32>
      %c0_21 = arith.constant 0 : index
      %c0_22 = arith.constant 0 : index
      %34 = vector.load %arg7[%c0_21, %c0_22] : memref<16x1xf32, #tpu.memory_space<vmem>>, vector<16x1xf32>
      %35 = arith.maximumf %34, %33 : vector<16x1xf32>
      %c0_23 = arith.constant 0 : index
      %c0_24 = arith.constant 0 : index
      %36 = vector.load %arg7[%c0_23, %c0_24] : memref<16x1xf32, #tpu.memory_space<vmem>>, vector<16x1xf32>
      %37 = arith.subf %36, %35 : vector<16x1xf32>
      %38 = math.exp %37 : vector<16x1xf32>
      %c0_25 = arith.constant 0 : index
      %c0_26 = arith.constant 0 : index
      %39 = vector.load %arg8[%c0_25, %c0_26] : memref<16x1xf32, #tpu.memory_space<vmem>>, vector<16x1xf32>
      %40 = arith.mulf %38, %39 : vector<16x1xf32>
      %41 = vector.broadcast %35 : vector<16x1xf32> to vector<16x128xf32>
      %42 = arith.subf %7, %41 : vector<16x128xf32>
      %43 = math.exp %42 : vector<16x128xf32>
      %cst_27 = arith.constant dense<0.000000e+00> : vector<16xf32>
      %44 = vector.multi_reduction <add>, %43, %cst_27 [1] : vector<16x128xf32> to vector<16xf32>
      %45 = vector.shape_cast %44 : vector<16xf32> to vector<16x1xf32>
      %46 = arith.addf %40, %45 : vector<16x1xf32>
      %c0_28 = arith.constant 0 : index
      %c0_29 = arith.constant 0 : index
      %47 = vector.load %arg8[%c0_28, %c0_29] : memref<16x1xf32, #tpu.memory_space<vmem>>, vector<16x1xf32>
      tpu.vector_store %arg8[%c0_28, %c0_29], %46 {strides = array<i32>} : memref<16x1xf32, #tpu.memory_space<vmem>>, vector<16x1xf32>,
      %c0_30 = arith.constant 0 : index
      %c0_31 = arith.constant 0 : index
      %48 = vector.load %arg7[%c0_30, %c0_31] : memref<16x1xf32, #tpu.memory_space<vmem>>, vector<16x1xf32>
      tpu.vector_store %arg7[%c0_30, %c0_31], %35 {strides = array<i32>} : memref<16x1xf32, #tpu.memory_space<vmem>>, vector<16x1xf32>,
    } else {
    }
    %c1_i32_16 = arith.constant 1 : i32
    %26 = arith.cmpi eq, %arg1, %c1_i32_16 : i32
    %27 = arith.extui %26 : i1 to i32
    %c0_i32_17 = arith.constant 0 : i32
    %28 = arith.cmpi ne, %27, %c0_i32_17 : i32
    scf.if %28 {
      %c200_i32 = arith.constant 200 : i32
      %32 = vector.broadcast %c200_i32 : i32 to vector<16x128xi32>
      %33 = arith.cmpi slt, %12, %32 : vector<16x128xi32>
      %cst_20 = arith.constant 0xFF800000 : f32
      %34 = vector.broadcast %cst_20 : f32 to vector<16x128xf32>
      %35 = arith.select %33, %7, %34 : vector<16x128xi1>, vector<16x128xf32>
      %cst_21 = arith.constant dense<0xFF800000> : vector<16xf32>
      %36 = vector.multi_reduction <maximumf>, %35, %cst_21 [1] : vector<16x128xf32> to vector<16xf32>
      %37 = vector.shape_cast %36 : vector<16xf32> to vector<16x1xf32>
      %c0_22 = arith.constant 0 : index
      %c0_23 = arith.constant 0 : index
      %38 = vector.load %arg7[%c0_22, %c0_23] : memref<16x1xf32, #tpu.memory_space<vmem>>, vector<16x1xf32>
      %39 = arith.maximumf %38, %37 : vector<16x1xf32>
      %c0_24 = arith.constant 0 : index
      %c0_25 = arith.constant 0 : index
      %40 = vector.load %arg7[%c0_24, %c0_25] : memref<16x1xf32, #tpu.memory_space<vmem>>, vector<16x1xf32>
      %41 = arith.subf %40, %39 : vector<16x1xf32>
      %42 = math.exp %41 : vector<16x1xf32>
      %c0_26 = arith.constant 0 : index
      %c0_27 = arith.constant 0 : index
      %43 = vector.load %arg8[%c0_26, %c0_27] : memref<16x1xf32, #tpu.memory_space<vmem>>, vector<16x1xf32>
      %44 = arith.mulf %42, %43 : vector<16x1xf32>
      %45 = vector.broadcast %39 : vector<16x1xf32> to vector<16x128xf32>
      %46 = arith.subf %35, %45 : vector<16x128xf32>
      %47 = math.exp %46 : vector<16x128xf32>
      %cst_28 = arith.constant dense<0.000000e+00> : vector<16xf32>
      %48 = vector.multi_reduction <add>, %47, %cst_28 [1] : vector<16x128xf32> to vector<16xf32>
      %49 = vector.shape_cast %48 : vector<16xf32> to vector<16x1xf32>
      %50 = arith.addf %44, %49 : vector<16x1xf32>
      %c0_29 = arith.constant 0 : index
      %c0_30 = arith.constant 0 : index
      %51 = vector.load %arg8[%c0_29, %c0_30] : memref<16x1xf32, #tpu.memory_space<vmem>>, vector<16x1xf32>
      tpu.vector_store %arg8[%c0_29, %c0_30], %50 {strides = array<i32>} : memref<16x1xf32, #tpu.memory_space<vmem>>, vector<16x1xf32>,
      %c0_31 = arith.constant 0 : index
      %c0_32 = arith.constant 0 : index
      %52 = vector.load %arg7[%c0_31, %c0_32] : memref<16x1xf32, #tpu.memory_space<vmem>>, vector<16x1xf32>
      tpu.vector_store %arg7[%c0_31, %c0_32], %39 {strides = array<i32>} : memref<16x1xf32, #tpu.memory_space<vmem>>, vector<16x1xf32>,
    } else {
    }
    %c1_i32_18 = arith.constant 1 : i32
    %29 = arith.cmpi eq, %arg1, %c1_i32_18 : i32
    %30 = arith.extui %29 : i1 to i32
    %c0_i32_19 = arith.constant 0 : i32
    %31 = arith.cmpi ne, %30, %c0_i32_19 : i32
    scf.if %31 {
      %c0_20 = arith.constant 0 : index
      %c0_21 = arith.constant 0 : index
      %32 = vector.load %arg7[%c0_20, %c0_21] : memref<16x1xf32, #tpu.memory_space<vmem>>, vector<16x1xf32>
      %c0_22 = arith.constant 0 : index
      %c0_23 = arith.constant 0 : index
      %33 = vector.load %arg8[%c0_22, %c0_23] : memref<16x1xf32, #tpu.memory_space<vmem>>, vector<16x1xf32>
      %34 = math.log %33 : vector<16x1xf32>
      %35 = arith.addf %32, %34 : vector<16x1xf32>
      %c0_24 = arith.constant 0 : index
      %c0_25 = arith.constant 0 : index
      %36 = vector.load %arg9[%c0_24, %c0_25] : memref<16x1xf32, #tpu.memory_space<vmem>>, vector<16x1xf32>
      %37 = arith.subf %35, %36 : vector<16x1xf32>
      %c0_26 = arith.constant 0 : index
      %c0_27 = arith.constant 0 : index
      %38 = vector.load %arg6[%c0_26, %c0_27] : memref<16x1xf32, #tpu.memory_space<vmem>>, vector<16x1xf32>
      tpu.vector_store %arg6[%c0_26, %c0_27], %37 {strides = array<i32>} : memref<16x1xf32, #tpu.memory_space<vmem>>, vector<16x1xf32>,
    } else {
    }
    return
  }
  func.func @transform_0(%arg0: i32, %arg1: i32) -> (i32, i32) {
    %c0_i32 = arith.constant 0 : i32
    %c0_i32_0 = arith.constant 0 : i32
    return %arg0, %c0_i32 : i32, i32
  }
  func.func @transform_1(%arg0: i32, %arg1: i32) -> (i32, i32) {
    %c0_i32 = arith.constant 0 : i32
    %c0_i32_0 = arith.constant 0 : i32
    return %arg1, %c0_i32 : i32, i32
  }
  func.func @transform_2(%arg0: i32, %arg1: i32) -> (i32, i32) {
    %c0_i32 = arith.constant 0 : i32
    %c0_i32_0 = arith.constant 0 : i32
    return %arg0, %c0_i32 : i32, i32
  }
  func.func @transform_3(%arg0: i32, %arg1: i32) -> (i32, i32) {
    %c0_i32 = arith.constant 0 : i32
    return %arg0, %arg1 : i32, i32
  }
  func.func @transform_4(%arg0: i32, %arg1: i32) -> (i32, i32) {
    %c0_i32 = arith.constant 0 : i32
    %c0_i32_0 = arith.constant 0 : i32
    return %arg0, %c0_i32 : i32, i32
  }
}

</mosaic_0001>

<bundles_post_ra>
// kernel: tpu_custom_call.1
= control target key start
LH: loop header
LB: loop body
LE: loop exit
PB: predicated region body
PF: predicated region fallthrough
CT: control target
= control target key end

     0   :  { %10 = vsyncpa [#allocation6], 0  ;;  %s1126_s0 = inlined_call_operand.vmem [shape: bf16[16,32], index: 0, kind: input, shape index: {}]   ;;  %s1127_s1 = inlined_call_operand.vmem [shape: bf16[256,32], index: 1, kind: input, shape index: {}]   ;;  %s1128_s2 = inlined_call_operand.vmem [shape: s32[16,1], index: 2, kind: input, shape index: {}]   ;;  %s1129_s3 = inlined_call_operand.hbm [shape: f32[16,256], index: 3, kind: output, shape index: {0}]   ;;  %s1130_s4 = inlined_call_operand.vmem [shape: f32[16,1], index: 4, kind: output, shape index: {1}]  }
   0x1   :  { %12 = vsyncpa [#allocation6 + $0x1], 0  ;;  %s952_s15 = smov 0   ;;  %s954_s16 = smov 0  }
   0x2   :  { %s956_s17 = smov 0   ;;  %s958_s18 = smov 0  }
   0x3   :  { %s960_s19 = smov 0   ;;  %s962_s20 = smov 0  }
   0x4 LB: > { %s685_s21 = sadd.s32 4294967295, %s917_s20   ;;  %s686_s22 = sadd.s32 4294967294, %s917_s20   ;;  %s917_s20 = sphi %s962_s20, %s18_s20   ;;  %s913_s19 = sphi %s960_s19, %s1137_s19   ;;  %s909_s18 = sphi %s958_s18, %s1136_s18   ;;  %s905_s17 = sphi %s956_s17, %s1135_s17   ;;  %s901_s16 = sphi %s954_s16, %s1134_s16   ;;  %s897_s15 = sphi %s952_s15, %s1133_s15  }
   0x5   : > { %s27_s23 = sadd.s32 1, %s913_s19  ;;  %s117_s24 = sadd.s32 1, %s905_s17 }
   0x6   : > { %p28_p0 = scmp.ge.s32.totalorder %s27_s23, 2  ;;  %p127_p1 = scmp.ne.s32.totalorder %s905_s17, %s901_s16 }
   0x7   : > { %p128_p2 = scmp.eq.s32.totalorder %s685_s21, 1  ;;  %p133_p3 = scmp.ne.s32.totalorder %s901_s16, %s897_s15 }
   0x8   : > { %s1139_s23 = smov (%p28_p0, %s27_s23), 0  ;;  %p134_p5 = scmp.eq.s32.totalorder %s686_s22, 1 }
   0x9   : > { %p992_p4 = por %p128_p2, %p127_p1  ;;  %s113_s26 = ssub.s32 %s913_s19, %s1139_s23 }
   0xa   : > { %p691_p6 = scmp.ge.s32.totalorder %s917_s20, 1  ;;  %p115_p7 = scmp.eq.s32.totalorder %s113_s26, 0 }
   0xb   : > { %p999_p8 = por %p134_p5, %p133_p3  ;;  %p205_p9 = scmp.lt.s32.totalorder %s917_s20, 3 }
   0xc   : > { %s1005_s28 = scalar_select %p115_p7, %s905_s17, %s117_s24  }
   0xd   : > { %p206_p10 = pnand %p691_p6, %p205_p9 }
   0xe   : > { %s236_s29 = sand.u32 (!%p206_p10), 1, %s901_s16   ;;  %s693_s30 = sshll.u32 (!%p206_p10), %s909_s18, 4 }
   0xf   : > { %209 = sbr.rel (%p206_p10) target bundleno = 1142 (0x476), region = 32  ;;  %s692_s5 = sshll.u32 (!%p206_p10), %s236_s29, 4 }
  0x10   : > { %p253_p11 = scmp.lt.s32.totalorder (!%p206_p10), %s693_s30, 31  ;;  %s1016_s10 = scalar_lea.vmem (!%p206_p10), [#allocation5], %s692_s5 }
  0x11   : > { %p695_p12 = scmp.ne.s32.totalorder (!%p206_p10), %s909_s18, 0 }
  0x14   : > { %s1141_s30 = smov (!%p253_p11, %s693_s30), 31  ;;  %274 = sbr.rel (%p695_p12) target bundleno = 32 (0x20), region = 36 }
  0x15   : > { %s694_s6 = sshll.u32 %s1141_s30, 2 }
  0x16   : > { %s1014_s9 = scalar_lea.vmem %s1127_s1, %s694_s6 }
  0x19   : > { %vm275_vm0 = vcmask 7168   ;;  %v919_v0 = vmov -inf   ;;  %v920_v1 = vmov 0.0  }
  0x1a   : > { %276 = vst.msk [vmem:[#allocation2] sm:$0xff] %vm275_vm0, %v919_v0 }
  0x1b   : > { %277 = vst.msk [vmem:[#allocation2 + $0x8] sm:$0xff] %vm275_vm0, %v919_v0 }
  0x1c   : > { %278 = vst.msk [vmem:[#allocation3] sm:$0xff] %vm275_vm0, %v920_v1 }
  0x1d   : > { %279 = vst.msk [vmem:[#allocation3 + $0x8] sm:$0xff] %vm275_vm0, %v920_v1 }
  0x1e   : > { %280 = vst.msk [vmem:[#allocation4] sm:$0xff] %vm275_vm0, %v920_v1 }
  0x1f   : > { %281 = vst.msk [vmem:[#allocation4 + $0x8] sm:$0xff] %vm275_vm0, %v920_v1 }
  0x20 PF: > { %v750_v2 = vld [vmem:[%s1014_s9 + $0x38] sm:$0xff]  ;;  %vm345_vm1 = vcmask 261120   ;;  %v749_v4 = vld [vmem:[%s1014_s9 + $0x30] sm:$0xff]  ;;  %v748_v6 = vld [vmem:[%s1014_s9 + $0x28] sm:$0xff]  ;;  %v921_v13 = vmov 0   ;;  %v391_v22 = vlaneseq  ;;  %s733_s24 = sshll.u32 %s909_s18, 7 }
  0x21   : > { %v371_v3 = vsel %vm345_vm1, %v750_v2, 0  ;;  %v368_v5 = vsel %vm345_vm1, %v749_v4, 0  ;;  %v365_v7 = vsel %vm345_vm1, %v748_v6, 0  ;;  %v747_v8 = vld [vmem:[%s1014_s9 + $0x20] sm:$0xff]  ;;  %v746_v10 = vld [vmem:[%s1014_s9 + $0x18] sm:$0xff]  ;;  %814 = vset.pattern.permute.xlu0 %v921_v13  ;;  %v745_v14 = vld [vmem:[%s1014_s9 + $0x10] sm:$0xff]  ;;  %v394_v24 = vstv %s733_s24 }
  0x22   : > { %373 = vmatpush.bf16.xpose.msra.mxu0 %v371_v3  ;;  %v362_v9 = vsel %vm345_vm1, %v747_v8, 0  ;;  %v359_v11 = vsel %vm345_vm1, %v746_v10, 0  ;;  %v396_v12 = vld [vmem:[%s1128_s2] sm:$0xff]  ;;  %v356_v15 = vsel %vm345_vm1, %v745_v14, 0  ;;  %v397_v16 = vld [vmem:[%s1128_s2 + $0x8] sm:$0xff]  ;;  %v392_v23 = vand.u32 127, %v391_v22 }
  0x23   : > { %399 = vperm.xlu0 %814, %v396_v12   ;;  %v744_v17 = vld [vmem:[%s1014_s9 + $0x8] sm:$0xff]  ;;  %v743_v19 = vld [vmem:[%s1014_s9] sm:$0xff]  ;;  %vm416_vm4 = vcmask 7168   ;;  %p734_p13 = scmp.eq.s32.totalorder %s909_s18, 1 }
  0x24   : > { %v353_v18 = vsel %vm345_vm1, %v744_v17, 0  ;;  %v350_v20 = vsel %vm345_vm1, %v743_v19, 0  ;;  %v742_v21 = vld [vmem:[%s1126_s0] sm:$0xff]  ;;  %v1046_v25 = vadd.s32 %v394_v24, %v392_v23 }
  0x25   : > { %v406_v34 = vld [vmem:[#allocation4] sm:$0xff] }
  0x26   : > { %v407_v37 = vld [vmem:[#allocation4 + $0x8] sm:$0xff] }
  0x2a   : > { %374 = vmatpush.bf16.xpose.msra.mxu0 %v368_v5 }
  0x2b   : > { %402 = vperm.xlu0 %814, %v397_v16  }
  0x32   : > { %375 = vmatpush.bf16.xpose.msra.mxu0 %v365_v7 }
  0x3a   : > { %376 = vmatpush.bf16.xpose.msra.mxu0 %v362_v9 }
  0x42   : > { %377 = vmatpush.bf16.xpose.msra.mxu0 %v359_v11 }
  0x4a   : > { %378 = vmatpush.bf16.xpose.msra.mxu0 %v356_v15 }
  0x52   : > { %379 = vmatpush.bf16.xpose.msra.mxu0 %v353_v18 }
  0x5a   : > { %380 = vmatpush.bf16.xpose.msra.mxu0 %v350_v20 }
  0x61   : > { %732 = vmatmul.msk.bf16.vlgmr.msra.gmra.mxu0 %vm345_vm1, %v742_v21 }
  0x95   : > { %v400_v26 = vpop.permute.xlu0 %399 }
  0x96   : > { %vm404_vm2 = vcmp.eq.s32.totalorder %v1046_v25, %v400_v26 }
  0x9d   : > { %v403_v30 = vpop.permute.xlu0 %402 }
  0x9e   : > { %vm405_vm3 = vcmp.eq.s32.totalorder %v1046_v25, %v403_v30 }
  0xde   : > { %v382_v27 = vpop.f32.mrf.mxu0 }
  0xdf   : > { %v1049_v28 = vmul.f32 2.0, %v382_v27 }
  0xe1   : > { %389 = vst [vmem:[%s1016_s10] sm:$0xff] %v1049_v28  ;;  %v408_v29 = vsel %vm404_vm2, %v1049_v28, 0.0 }
  0xe2   : > { %410 = vadd.xlane.f32.xlu1 %v408_v29 }
  0xe6   : > { %v384_v31 = vpop.f32.mrf.mxu0 }
  0xe7   : > { %v1054_v32 = vmul.f32 2.0, %v384_v31 }
  0xe9   : > { %390 = vst [vmem:[%s1016_s10 + $0x8] sm:$0xff] %v1054_v32  ;;  %v409_v33 = vsel %vm405_vm3, %v1054_v32, 0.0 }
  0xea   : > { %412 = vadd.xlane.f32.xlu1 %v409_v33 }
 0x155   : > { %v411_v35 = vpop.xlane.xlu1 %410 }
 0x156   : > { %v414_v36 = vadd.f32 %v411_v35, %v406_v34 }
 0x158   : > { %417 = vst.msk [vmem:[#allocation4] sm:$0xff] %vm416_vm4, %v414_v36 }
 0x15c   : > { %422 = sbr.rel (%p734_p13) target bundleno = 724 (0x2d4), region = 40 }
 0x15d   : > { %v413_v38 = vpop.xlane.xlu1 %412 }
 0x15e   : > { %v415_v39 = vadd.f32 %v413_v38, %v407_v37 }
 0x160   : > { %418 = vst.msk [vmem:[#allocation4 + $0x8] sm:$0xff] %vm416_vm4, %v415_v39 }
 0x161   : > { %423 = vmax.xlane.f32.xlu0 %v1049_v28  ;;  %v922_v40 = vmov 0   ;;  %v427_v41 = vld [vmem:[#allocation2] sm:$0xff]  ;;  %v428_v45 = vld [vmem:[#allocation2 + $0x8] sm:$0xff]  ;;  %v437_v60 = vld [vmem:[#allocation3] sm:$0xff] }
 0x162   : > { %815 = vset.pattern.permute.xlu1 %v922_v40  ;;  %816 = vset.pattern.permute.xlu0 %v922_v40  ;;  %v438_v1 = vld [vmem:[#allocation3 + $0x8] sm:$0xff] }
 0x169   : > { %425 = vmax.xlane.f32.xlu0 %v1054_v32 }
 0x1d4   : > { %v424_v42 = vpop.xlane.xlu0 %423 }
 0x1d5   : > { %v429_v43 = vmax.f32 %v427_v41, %v424_v42 }
 0x1d7   : > { %v431_v44 = vsub.f32 %v427_v41, %v429_v43  ;;  %465 = vst.msk [vmem:[#allocation2] sm:$0xff] %vm416_vm4, %v429_v43  ;;  %443 = vperm.xlu1 %815, %v429_v43  }
 0x1d9   : > { %v433_v57 = vmul.f32 1.442695, %v431_v44 }
 0x1dc   : > { %v426_v46 = vpop.xlane.xlu0 %425 }
 0x1dd   : > { %v430_v47 = vmax.f32 %v428_v45, %v426_v46 }
 0x1df   : > { %v432_v48 = vsub.f32 %v428_v45, %v430_v47  ;;  %466 = vst.msk [vmem:[#allocation2 + $0x8] sm:$0xff] %vm416_vm4, %v430_v47  ;;  %448 = vperm.xlu1 %815, %v430_v47  }
 0x1e1   : > { %v435_v58 = vmul.f32 1.442695, %v432_v48 }
 0x249   : > { %v444_v49 = vpop.permute.xlu1 %443 }
 0x24a   : > { %v451_v50 = vsub.f32 %v1049_v28, %v444_v49 }
 0x24c   : > { %v453_v51 = vmul.f32 1.442695, %v451_v50 }
 0x24e   : > { %817 = vpow2.f32 %v453_v51 }
 0x251   : > { %v449_v52 = vpop.permute.xlu1 %448 }
 0x252   : > { %v452_v53 = vsub.f32 %v1054_v32, %v449_v52 }
 0x254   : > { %v818_v54 = vpop.eup %817  ;;  %v455_v55 = vmul.f32 1.442695, %v452_v53 }
 0x255   : > { %457 = vadd.xlane.f32.xlu2 %v818_v54 }
 0x256   : > { %819 = vpow2.f32 %v455_v55 }
 0x257   : > { %821 = vpow2.f32 %v433_v57 }
 0x258   : > { %823 = vpow2.f32 %v435_v58 }
 0x25c   : > { %v820_v56 = vpop.eup %819 }
 0x25d   : > { %459 = vadd.xlane.f32.xlu2 %v820_v56  ;;  %v822_v59 = vpop.eup %821 }
 0x25e   : > { %v439_v61 = vmul.f32 %v822_v59, %v437_v60  ;;  %v824_v0 = vpop.eup %823 }
 0x25f   : > { %v440_v2 = vmul.f32 %v824_v0, %v438_v1 }
 0x2c8   : > { %v458_v62 = vpop.xlane.xlu2 %457 }
 0x2c9   : > { %v461_v63 = vadd.f32 %v458_v62, %v439_v61 }
 0x2cb   : > { %463 = vst.msk [vmem:[#allocation3] sm:$0xff] %vm416_vm4, %v461_v63 }
 0x2d0   : > { %v460_v3 = vpop.xlane.xlu2 %459 }
 0x2d1   : > { %v462_v4 = vadd.f32 %v460_v3, %v440_v2 }
 0x2d3   : > { %464 = vst.msk [vmem:[#allocation3 + $0x8] sm:$0xff] %vm416_vm4, %v462_v4 }
 0x2d4 PF: > { %p735_p0 = scmp.ne.s32.totalorder %s909_s18, 1 }
 0x2d6   : > { %470 = sbr.rel (%p735_p0) target bundleno = 1125 (0x465), region = 44 }
 0x2db   : > { %vm471_vm5 = vcmp.lt.s32.totalorder %v1046_v25, 200  ;;  %v923_v7 = vmov 0   ;;  %v478_v8 = vld [vmem:[#allocation2] sm:$0xff]  ;;  %v479_v12 = vld [vmem:[#allocation2 + $0x8] sm:$0xff]  ;;  %v488_v27 = vld [vmem:[#allocation3] sm:$0xff] }
 0x2dc   : > { %v472_v5 = vsel %vm471_vm5, %v1049_v28, -inf  ;;  %v473_v6 = vsel %vm471_vm5, %v1054_v32, -inf  ;;  %825 = vset.pattern.permute.xlu1 %v923_v7  ;;  %826 = vset.pattern.permute.xlu0 %v923_v7  ;;  %v489_v32 = vld [vmem:[#allocation3 + $0x8] sm:$0xff]  ;;  %v528_v41 = vld [vmem:[#allocation4] sm:$0xff]  ;;  %v529_v47 = vld [vmem:[#allocation4 + $0x8] sm:$0xff] }
 0x2dd   : > { %474 = vmax.xlane.f32.xlu0 %v472_v5 }
 0x2e5   : > { %476 = vmax.xlane.f32.xlu0 %v473_v6 }
 0x350   : > { %v475_v9 = vpop.xlane.xlu0 %474 }
 0x351   : > { %v480_v10 = vmax.f32 %v478_v8, %v475_v9 }
 0x353   : > { %v482_v11 = vsub.f32 %v478_v8, %v480_v10  ;;  %516 = vst.msk [vmem:[#allocation2] sm:$0xff] %vm416_vm4, %v480_v10  ;;  %494 = vperm.xlu1 %825, %v480_v10  }
 0x355   : > { %v484_v24 = vmul.f32 1.442695, %v482_v11 }
 0x358   : > { %v477_v13 = vpop.xlane.xlu0 %476 }
 0x359   : > { %v481_v14 = vmax.f32 %v479_v12, %v477_v13 }
 0x35a   : > { %v518_v40 = vld [vmem:[#allocation2] sm:$0xff] }
 0x35b   : > { %v483_v15 = vsub.f32 %v479_v12, %v481_v14  ;;  %517 = vst.msk [vmem:[#allocation2 + $0x8] sm:$0xff] %vm416_vm4, %v481_v14  ;;  %499 = vperm.xlu1 %825, %v481_v14  }
 0x35d   : > { %v486_v25 = vmul.f32 1.442695, %v483_v15 }
 0x362   : > { %v519_v46 = vld [vmem:[#allocation2 + $0x8] sm:$0xff] }
 0x3c5   : > { %v495_v16 = vpop.permute.xlu1 %494 }
 0x3c6   : > { %v502_v17 = vsub.f32 %v472_v5, %v495_v16 }
 0x3c8   : > { %v504_v18 = vmul.f32 1.442695, %v502_v17 }
 0x3ca   : > { %827 = vpow2.f32 %v504_v18 }
 0x3cd   : > { %v500_v19 = vpop.permute.xlu1 %499 }
 0x3ce   : > { %v503_v20 = vsub.f32 %v473_v6, %v500_v19 }
 0x3d0   : > { %v828_v21 = vpop.eup %827  ;;  %v506_v22 = vmul.f32 1.442695, %v503_v20 }
 0x3d1   : > { %508 = vadd.xlane.f32.xlu2 %v828_v21 }
 0x3d2   : > { %829 = vpow2.f32 %v506_v22 }
 0x3d3   : > { %831 = vpow2.f32 %v484_v24 }
 0x3d4   : > { %833 = vpow2.f32 %v486_v25 }
 0x3d8   : > { %v830_v23 = vpop.eup %829 }
 0x3d9   : > { %510 = vadd.xlane.f32.xlu2 %v830_v23  ;;  %v832_v26 = vpop.eup %831 }
 0x3da   : > { %v490_v28 = vmul.f32 %v832_v26, %v488_v27  ;;  %v834_v31 = vpop.eup %833 }
 0x3db   : > { %v491_v33 = vmul.f32 %v834_v31, %v489_v32 }
 0x444   : > { %v509_v29 = vpop.xlane.xlu2 %508 }
 0x445   : > { %v512_v30 = vadd.f32 %v509_v29, %v490_v28 }
 0x447   : > { %514 = vst.msk [vmem:[#allocation3] sm:$0xff] %vm416_vm4, %v512_v30 }
 0x44c   : > { %v511_v34 = vpop.xlane.xlu2 %510 }
 0x44d   : > { %v513_v35 = vadd.f32 %v511_v34, %v491_v33 }
 0x44e   : > { %v520_v36 = vld [vmem:[#allocation3] sm:$0xff] }
 0x44f   : > { %835 = vlog2.f32 %v520_v36  ;;  %515 = vst.msk [vmem:[#allocation3 + $0x8] sm:$0xff] %vm416_vm4, %v513_v35 }
 0x455   : > { %v836_v37 = vpop.eup %835 }
 0x456   : > { %v523_v38 = vmul.f32 0.6931472, %v836_v37  ;;  %v521_v39 = vld [vmem:[#allocation3 + $0x8] sm:$0xff] }
 0x457   : > { %837 = vlog2.f32 %v521_v39 }
 0x458   : > { %v526_v42 = vadd.f32 %v523_v38, %v518_v40 }
 0x45a   : > { %v530_v43 = vsub.f32 %v526_v42, %v528_v41 }
 0x45c   : > { %532 = vst.msk [vmem:[%s1130_s4] sm:$0xff] %vm416_vm4, %v530_v43 }
 0x45d   : > { %v838_v44 = vpop.eup %837 }
 0x45e   : > { %v525_v45 = vmul.f32 0.6931472, %v838_v44 }
 0x460   : > { %v527_v48 = vadd.f32 %v525_v45, %v519_v46 }
 0x462   : > { %v531_v49 = vsub.f32 %v527_v48, %v529_v47 }
 0x464   : > { %533 = vst.msk [vmem:[%s1130_s4 + $0x8] sm:$0xff] %vm416_vm4, %v531_v49 }
 0x465 PF: > { %s737_s7 = sshll.u32 %s909_s18, 3  ;;  %s554_s12 = sshll.u32 %s1016_s10, 4  ;;  %s555_s12 = int_to_ptr.vmem [resolvable:$true] %s554_s12 }
 0x466   : > { %s553_s11 = scalar_lea.hbm %s1129_s3, %s737_s7  ;;  %s535_s14 = scalar_lea.sflag [#allocation6], %s236_s29 }
 0x467   : > { %s556_s13 = sshll.u32 %s553_s11, 4  ;;  %s859_s18 = scalar_lea.hbm %s1129_s3, 32  ;;  %s557_s13 = int_to_ptr.hbm [resolvable:$true] %s556_s13 }
 0x468   : > { %s853_s21 = sshra.s32 %s557_s13, 4  ;;  %s854_s21 = int_to_ptr.hbm [resolvable:$true] %s853_s21 }
 0x469   : > { %s855_s22 = scalar_lea.hbm %s854_s21, 16  ;;  %p860_p5 = scmp.lt.s32.totalorder %s854_s21, %s1129_s3 }
 0x46a   : > { %p856_p1 = scmp.ne.s32.totalorder %s854_s21, %s855_s22  ;;  %p861_p6 = scmp.lt.s32.totalorder %s859_s18, %s855_s22 }
 0x46c   : > { %p857_p2 = pnand %p856_p1, %p992_p4  ;;  %p862_p7 = por %p861_p6, %p860_p5 }
 0x46e   : > { %p858_p3 = pneg %p857_p2 }
 0x470   : > { %p863_p9 = pnand %p862_p7, %p858_p3 }
 0x472   : > { %866 = shalt.err (!%p863_p9)
}
 0x473   : > { %s924_s29 = smov 128   ;;  %s925_s10 = smov 256  }
 0x474   : > { %s926_s6 = smov 8  }
 0x475   : > { %751 = dma.vmem_to_hbm [thread:$0]  (%p992_p4), %s555_s12, 256, %s557_s13, %s535_s14, %s924_s29, %s925_s10, %s926_s6  }
 0x476 PF: > { %p757_p10 = scmp.ge.s32.totalorder %s917_s20, 2  ;;  %s583_s7 = sand.u32 1, %s897_s15  }
 0x477   : > { %s584_s8 = scalar_lea.sflag [#allocation6], %s583_s7 }
 0x478   : > { %p754_p11 = pnand %p757_p10, %p999_p8 }
 0x47a   : > { %p755_p12 = pneg %p754_p11 }
 0x47c   : > { %892 = dma.done.wait (%p755_p12), %s584_s8, 256  }
 0x47d   : > { %894 = vsyncadd (%p755_p12), %s584_s8, 4294967040  ;;  %s18_s20 = sadd.s32 1, %s917_s20   ;;  %s1133_s15 = smov %s901_s16 }
 0x47e   : > { %p15_p13 = scmp.ge.s32.totalorder %s18_s20, 4   ;;  %s1134_s16 = smov %s905_s17 }
 0x47f   : > { %s1135_s17 = smov %s1005_s28  ;;  %s1136_s18 = smov %s913_s19 }
 0x480   : > { %s1137_s19 = smov %s1139_s23  ;;  %17 = sbr.rel (!%p15_p13) target bundleno = 4 (0x4), region = 97 }
 0x485   :  { %590 = vsyncpa [#allocation6], 1 }
 0x486   :  { %592 = vsyncpa [#allocation6 + $0x1], 1 }

</bundles_post_ra>
